<compile_context>
chip_gen: v7x
topology: tpu7x:2x2x1
jax: 0.10.0
libtpu: 0.0.40
codegen_flags: <defaults>
</compile_context>

<pallas_src>
import functools
import math

import jax
import jax.numpy as jnp
from jax.experimental import pallas as pl
from jax.experimental.pallas import tpu as pltpu

LN_EPS = 1e-12                      # BERT default layer_norm_eps
VMEM_LIMIT = 64 * 1024 * 1024       # explicit scoped-VMEM budget (fits v7x 64 MiB)


def _layernorm(x, gamma, beta):
    mu = jnp.mean(x, axis=-1, keepdims=True)
    var = jnp.mean(jnp.square(x - mu), axis=-1, keepdims=True)
    return (x - mu) * jax.lax.rsqrt(var + LN_EPS) * gamma + beta


# ------------------------- embeddings path (layer_num == 0) -------------------------
def _emb_kernel(we_ref, te_ref, pe_ref, g_ref, b_ref, o_ref):
    x = we_ref[...] + te_ref[...] + pe_ref[...]          # (Bt,S,H) + (Bt,S,H) + (S,H)
    o_ref[...] = _layernorm(x, g_ref[...], b_ref[...])


def bert_embeddings(params, inp_ids, token_type_ids):
    # Embedding-table gathers are glue (plain JAX); add + LayerNorm run in the kernel.
    B, S = inp_ids.shape
    H = params["word_emb"].shape[-1]
    word_e = params["word_emb"][inp_ids]                 # (B, S, H)
    tok_e = params["tok_emb"][token_type_ids]            # (B, S, H)
    pos_e = params["pos_emb"][:S]                        # (S, H)
    # TODO(synk): HF BertEmbeddings applies dropout after LayerNorm; omitted (eval mode).
    bt = min(B, 8)                                       # multiple batch rows per block
    grid = (pl.cdiv(B, bt),)
    row = lambda: pl.BlockSpec((bt, S, H), lambda b: (b, 0, 0))
    return pl.pallas_call(
        _emb_kernel,
        out_shape=jax.ShapeDtypeStruct((B, S, H), jnp.float32),
        grid=grid,
        in_specs=[
            row(), row(),
            pl.BlockSpec(pos_e.shape, lambda b: (0, 0)),
            pl.BlockSpec(params["emb_ln_g"].shape, lambda b: (0, 0)),
            pl.BlockSpec(params["emb_ln_b"].shape, lambda b: (0, 0)),
        ],
        out_specs=row(),
        compiler_params=pltpu.CompilerParams(
            dimension_semantics=("parallel",),
            vmem_limit_bytes=VMEM_LIMIT),
    )(word_e, tok_e, pos_e, params["emb_ln_g"], params["emb_ln_b"])


# ------------------------- encoder layer path (layer_num > 0) -----------------------
def _layer_kernel(xq_ref, xkv_ref, mask_ref,
                  wq_ref, bq_ref, wkv_ref, bkv_ref, wo_ref, bo_ref,
                  ln1g_ref, ln1b_ref,
                  w1_ref, b1_ref, w2_ref, b2_ref,
                  ln2g_ref, ln2b_ref,
                  o_ref, ctx_scratch, *, num_heads):
    """Fused BertLayer: self-attention + add&LN + FFN + add&LN for one query tile."""
    xq = xq_ref[0]                   # (Sq, H) f32  -- query rows of this grid step
    xkv = xkv_ref[0]                 # (S,  H) f32  -- full sequence (K/V source)
    mask_row = mask_ref[0]           # (1,  S) f32  -- additive attention mask
    Sq, H = xq.shape
    S = xkv.shape[0]
    dh = H // num_heads
    scale = 1.0 / math.sqrt(dh)

    xq_b = xq.astype(jnp.bfloat16)
    xkv_b = xkv.astype(jnp.bfloat16)

    # Full-width MXU matmuls: Q for the query tile, fused K|V for the whole sequence.
    q = jnp.dot(xq_b, wq_ref[...], preferred_element_type=jnp.float32) + bq_ref[...]
    kv = jnp.dot(xkv_b, wkv_ref[...], preferred_element_type=jnp.float32) + bkv_ref[...]
    q = (q * scale).astype(jnp.bfloat16)        # fold 1/sqrt(dh) into Q once
    k = kv[:, :H].astype(jnp.bfloat16)
    v = kv[:, H:].astype(jnp.bfloat16)

    # Hoisted mask broadcast (JAX does not CSE broadcast_in_dim inside the head loop).
    mask_b = jnp.broadcast_to(mask_row, (Sq, S))

    # Per-head attention; each head's context is written into a VMEM slab so the
    # output projection below is a single full-width (Sq,H) x (H,H) matmul.
    for h in range(num_heads):
        sl = slice(h * dh, (h + 1) * dh)
        s = jax.lax.dot_general(q[:, sl], k[:, sl], (((1,), (1,)), ((), ())),
                                preferred_element_type=jnp.float32)      # (Sq, S) f32
        s = s + mask_b                           # mask stays in the f32 score path
        s = s - jnp.max(s, axis=-1, keepdims=True)
        p = jnp.exp(s)
        inv = pl.reciprocal(jnp.sum(p, axis=-1, keepdims=True), approx=True)
        p = p * inv
        ctx_scratch[:, sl] = jnp.dot(p.astype(jnp.bfloat16), v[:, sl],
                                     preferred_element_type=jnp.float32)

    # Single full-width output projection (BertSelfOutput) + residual + LayerNorm.
    attn = jnp.dot(ctx_scratch[...].astype(jnp.bfloat16), wo_ref[...],
                   preferred_element_type=jnp.float32) + bo_ref[...]
    h1 = _layernorm(xq + attn, ln1g_ref[...], ln1b_ref[...])

    # FFN fused in the same kernel (BertIntermediate + BertOutput).
    f = jnp.dot(h1.astype(jnp.bfloat16), w1_ref[...],
                preferred_element_type=jnp.float32) + b1_ref[...]
    # TODO(synk): stock BERT uses exact erf-GELU; tanh-approx GELU used here.
    f = jax.nn.gelu(f, approximate=True)
    y = jnp.dot(f.astype(jnp.bfloat16), w2_ref[...],
                preferred_element_type=jnp.float32) + b2_ref[...]
    o_ref[0] = _layernorm(h1 + y, ln2g_ref[...], ln2b_ref[...])


def bert_layer(lp, hidden, ext_mask, *, num_heads, q_tile=256):
    B, S, H = hidden.shape
    Sq = S if S <= q_tile else q_tile            # query-row tile (caps (S,S) working set)
    n_q = pl.cdiv(S, Sq)
    grid = (B, n_q)                              # 2 parallel axes -> both v7x TCs usable

    def const(a):                                # weight / bias resident block
        return pl.BlockSpec(a.shape, lambda b, q, _z=(0,) * a.ndim: _z)

    kernel = functools.partial(_layer_kernel, num_heads=num_heads)
    return pl.pallas_call(
        kernel,
        out_shape=jax.ShapeDtypeStruct((B, S, H), jnp.float32),
        grid=grid,
        in_specs=[
            pl.BlockSpec((1, Sq, H), lambda b, q: (b, q, 0)),    # query-row tile
            pl.BlockSpec((1, S, H), lambda b, q: (b, 0, 0)),     # full sequence (K/V)
            pl.BlockSpec((1, 1, S), lambda b, q: (b, 0, 0)),     # additive mask
            const(lp["wq"]), const(lp["bq"]),
            const(lp["wkv"]), const(lp["bkv"]),
            const(lp["wo"]), const(lp["bo"]),
            const(lp["ln1_g"]), const(lp["ln1_b"]),
            const(lp["w_ffn1"]), const(lp["b_ffn1"]),
            const(lp["w_ffn2"]), const(lp["b_ffn2"]),
            const(lp["ln2_g"]), const(lp["ln2_b"]),
        ],
        out_specs=pl.BlockSpec((1, Sq, H), lambda b, q: (b, q, 0)),
        scratch_shapes=[pltpu.VMEM((Sq, H), jnp.float32)],       # per-head context slab
        compiler_params=pltpu.CompilerParams(
            dimension_semantics=("parallel", "parallel"),
            vmem_limit_bytes=VMEM_LIMIT),
    )(hidden, hidden, ext_mask,
      lp["wq"], lp["bq"], lp["wkv"], lp["bkv"], lp["wo"], lp["bo"],
      lp["ln1_g"], lp["ln1_b"],
      lp["w_ffn1"], lp["b_ffn1"], lp["w_ffn2"], lp["b_ffn2"],
      lp["ln2_g"], lp["ln2_b"])


# ------------------------- LayerBert.forward equivalent ----------------------------
def layer_bert_forward(params, layer_num, inp_ids, attn_masks, *, num_heads):
    if layer_num == 0:
        # attn_masks is (ab)used as token_type_ids, exactly as in the PyTorch module
        return bert_embeddings(params, inp_ids, token_type_ids=attn_masks)
    # for layer_num > 0 the "inp_ids" argument actually carries hidden states (B, S, H)
    hidden = inp_ids.astype(jnp.float32)
    B, S = attn_masks.shape
    # get_extended_attention_mask: (1 - mask) * finfo(dtype).min
    ext = (1.0 - attn_masks.astype(jnp.float32)) * jnp.finfo(jnp.float32).min
    ext = ext.reshape(B, 1, S)   # broadcast over (heads, query) inside the kernel
    return bert_layer(params["layers"][layer_num - 1], hidden, ext, num_heads=num_heads)


# ------------------------- deterministic parameter init ----------------------------
def init_params(key, *, vocab=100, type_vocab=2, max_pos=64, hidden=128,
                intermediate=512, num_layers=1):
    std = 0.02
    keys = jax.random.split(key, 3 + num_layers)

    def lin(k, din, dout):
        w = (std * jax.random.normal(k, (din, dout), jnp.float32)).astype(jnp.bfloat16)
        return w, jnp.zeros((1, dout), jnp.float32)

    params = {
        "word_emb": std * jax.random.normal(keys[0], (vocab, hidden), jnp.float32),
        "pos_emb":  std * jax.random.normal(keys[1], (max_pos, hidden), jnp.float32),
        "tok_emb":  std * jax.random.normal(keys[2], (type_vocab, hidden), jnp.float32),
        "emb_ln_g": jnp.ones((1, hidden), jnp.float32),
        "emb_ln_b": jnp.zeros((1, hidden), jnp.float32),
        "layers": [],
    }
    for l in range(num_layers):
        lk = jax.random.split(keys[3 + l], 6)
        wq, bq = lin(lk[0], hidden, hidden)
        wk, bk = lin(lk[1], hidden, hidden)
        wv, bv = lin(lk[2], hidden, hidden)
        wo, bo = lin(lk[3], hidden, hidden)
        w1, b1 = lin(lk[4], hidden, intermediate)
        w2, b2 = lin(lk[5], intermediate, hidden)
        params["layers"].append({
            "wq": wq, "bq": bq,
            "wkv": jnp.concatenate([wk, wv], axis=1),   # fused K|V weight (H, 2H) bf16
            "bkv": jnp.concatenate([bk, bv], axis=1),   # (1, 2H) f32
            "wo": wo, "bo": bo,
            "ln1_g": jnp.ones((1, hidden), jnp.float32),
            "ln1_b": jnp.zeros((1, hidden), jnp.float32),
            "w_ffn1": w1, "b_ffn1": b1, "w_ffn2": w2, "b_ffn2": b2,
            "ln2_g": jnp.ones((1, hidden), jnp.float32),
            "ln2_b": jnp.zeros((1, hidden), jnp.float32),
        })
    return params


if __name__ == "__main__":
    B, S, H, NH, INTER, VOCAB = 2, 8, 128, 4, 512, 100

    key = jax.random.PRNGKey(0)
    pkey, ikey = jax.random.split(key)
    params = init_params(pkey, vocab=VOCAB, hidden=H, intermediate=INTER, num_layers=1)

    inp_ids = jax.random.randint(ikey, (B, S), 0, VOCAB, dtype=jnp.int32)
    attn_masks = jnp.array([[1] * S, [1] * (S - 2) + [0, 0]], dtype=jnp.int32)

    # layer_num == 0 : embeddings path (attn_masks used as token_type_ids -> values in {0,1})
    emb_out = layer_bert_forward(params, 0, inp_ids, attn_masks, num_heads=NH)
    emb_out = jax.block_until_ready(emb_out)

    # layer_num == 1 : encoder-layer path ("inp_ids" now carries hidden states)
    layer_out = layer_bert_forward(params, 1, emb_out, attn_masks, num_heads=NH)
    layer_out = jax.block_until_ready(layer_out)

    assert emb_out.shape == (B, S, H) and layer_out.shape == (B, S, H)
    assert bool(jnp.all(jnp.isfinite(emb_out))) and bool(jnp.all(jnp.isfinite(layer_out)))
    print("KERNEL_OK")
</pallas_src>

<mosaic_0001>
module attributes {stable_mosaic.version = 11 : i64} {
  func.func @_emb_kernel(%arg0: i32, %arg1: memref<2x8x128xf32, #tpu.memory_space<vmem>>, %arg2: memref<2x8x128xf32, #tpu.memory_space<vmem>>, %arg3: memref<8x128xf32, #tpu.memory_space<vmem>>, %arg4: memref<1x128xf32, #tpu.memory_space<vmem>>, %arg5: memref<1x128xf32, #tpu.memory_space<vmem>>, %arg6: memref<2x8x128xf32, #tpu.memory_space<vmem>>) attributes {dimension_semantics = [#tpu.dimension_semantics<parallel>], iteration_bounds = array<i64: 1>, scalar_prefetch = 0 : i64, scratch_operands = 0 : i64, tpu.core_type = #tpu.core_type<tc>, window_params = [{transform_indices = @transform_0, window_bounds = array<i64: 2, 8, 128>}, {transform_indices = @transform_1, window_bounds = array<i64: 2, 8, 128>}, {pipeline_mode = #tpu.pipeline_mode<synchronous>, transform_indices = @transform_2, window_bounds = array<i64: 8, 128>}, {pipeline_mode = #tpu.pipeline_mode<synchronous>, transform_indices = @transform_3, window_bounds = array<i64: 1, 128>}, {pipeline_mode = #tpu.pipeline_mode<synchronous>, transform_indices = @transform_4, window_bounds = array<i64: 1, 128>}, {transform_indices = @transform_5, window_bounds = array<i64: 2, 8, 128>}]} {
    %c0 = arith.constant 0 : index
    %c0_0 = arith.constant 0 : index
    %c0_1 = arith.constant 0 : index
    %0 = vector.load %arg1[%c0, %c0_0, %c0_1] : memref<2x8x128xf32, #tpu.memory_space<vmem>>, vector<2x8x128xf32>
    %c0_2 = arith.constant 0 : index
    %c0_3 = arith.constant 0 : index
    %c0_4 = arith.constant 0 : index
    %1 = vector.load %arg2[%c0_2, %c0_3, %c0_4] : memref<2x8x128xf32, #tpu.memory_space<vmem>>, vector<2x8x128xf32>
    %2 = arith.addf %0, %1 : vector<2x8x128xf32>
    %c0_5 = arith.constant 0 : index
    %c0_6 = arith.constant 0 : index
    %3 = vector.load %arg3[%c0_5, %c0_6] : memref<8x128xf32, #tpu.memory_space<vmem>>, vector<8x128xf32>
    %4 = vector.shape_cast %3 : vector<8x128xf32> to vector<1x8x128xf32>
    %5 = vector.broadcast %4 : vector<1x8x128xf32> to vector<2x8x128xf32>
    %6 = arith.addf %2, %5 : vector<2x8x128xf32>
    %c0_7 = arith.constant 0 : index
    %c0_8 = arith.constant 0 : index
    %7 = vector.load %arg4[%c0_7, %c0_8] : memref<1x128xf32, #tpu.memory_space<vmem>>, vector<1x128xf32>
    %c0_9 = arith.constant 0 : index
    %c0_10 = arith.constant 0 : index
    %8 = vector.load %arg5[%c0_9, %c0_10] : memref<1x128xf32, #tpu.memory_space<vmem>>, vector<1x128xf32>
    %cst = arith.constant dense<0.000000e+00> : vector<2x8xf32>
    %9 = vector.multi_reduction <add>, %6, %cst [2] : vector<2x8x128xf32> to vector<2x8xf32>
    %10 = vector.shape_cast %9 : vector<2x8xf32> to vector<2x8x1xf32>
    %cst_11 = arith.constant 1.280000e+02 : f32
    %11 = vector.broadcast %cst_11 : f32 to vector<2x8x1xf32>
    %12 = arith.divf %10, %11 : vector<2x8x1xf32>
    %13 = vector.broadcast %12 : vector<2x8x1xf32> to vector<2x8x128xf32>
    %14 = arith.subf %6, %13 : vector<2x8x128xf32>
    %15 = arith.mulf %14, %14 : vector<2x8x128xf32>
    %cst_12 = arith.constant dense<0.000000e+00> : vector<2x8xf32>
    %16 = vector.multi_reduction <add>, %15, %cst_12 [2] : vector<2x8x128xf32> to vector<2x8xf32>
    %17 = vector.shape_cast %16 : vector<2x8xf32> to vector<2x8x1xf32>
    %cst_13 = arith.constant 1.280000e+02 : f32
    %18 = vector.broadcast %cst_13 : f32 to vector<2x8x1xf32>
    %19 = arith.divf %17, %18 : vector<2x8x1xf32>
    %20 = vector.broadcast %12 : vector<2x8x1xf32> to vector<2x8x128xf32>
    %21 = arith.subf %6, %20 : vector<2x8x128xf32>
    %cst_14 = arith.constant 9.99999996E-13 : f32
    %22 = vector.broadcast %cst_14 : f32 to vector<2x8x1xf32>
    %23 = arith.addf %19, %22 : vector<2x8x1xf32>
    %24 = math.rsqrt %23 : vector<2x8x1xf32>
    %25 = vector.broadcast %24 : vector<2x8x1xf32> to vector<2x8x128xf32>
    %26 = arith.mulf %21, %25 : vector<2x8x128xf32>
    %27 = vector.shape_cast %7 : vector<1x128xf32> to vector<1x1x128xf32>
    %28 = vector.broadcast %27 : vector<1x1x128xf32> to vector<2x8x128xf32>
    %29 = arith.mulf %26, %28 : vector<2x8x128xf32>
    %30 = vector.shape_cast %8 : vector<1x128xf32> to vector<1x1x128xf32>
    %31 = vector.broadcast %30 : vector<1x1x128xf32> to vector<2x8x128xf32>
    %32 = arith.addf %29, %31 : vector<2x8x128xf32>
    %c0_15 = arith.constant 0 : index
    %c0_16 = arith.constant 0 : index
    %c0_17 = arith.constant 0 : index
    %33 = vector.load %arg6[%c0_15, %c0_16, %c0_17] : memref<2x8x128xf32, #tpu.memory_space<vmem>>, vector<2x8x128xf32>
    tpu.vector_store %arg6[%c0_15, %c0_16, %c0_17], %32 {strides = array<i32>} : memref<2x8x128xf32, #tpu.memory_space<vmem>>, vector<2x8x128xf32>,
    return
  }
  func.func @transform_0(%arg0: i32) -> (i32, i32, i32) {
    %c0_i32 = arith.constant 0 : i32
    %c0_i32_0 = arith.constant 0 : i32
    %c0_i32_1 = arith.constant 0 : i32
    return %arg0, %c0_i32, %c0_i32_0 : i32, i32, i32
  }
  func.func @transform_1(%arg0: i32) -> (i32, i32, i32) {
    %c0_i32 = arith.constant 0 : i32
    %c0_i32_0 = arith.constant 0 : i32
    %c0_i32_1 = arith.constant 0 : i32
    return %arg0, %c0_i32, %c0_i32_0 : i32, i32, i32
  }
  func.func @transform_2(%arg0: i32) -> (i32, i32) {
    %c0_i32 = arith.constant 0 : i32
    %c0_i32_0 = arith.constant 0 : i32
    %c0_i32_1 = arith.constant 0 : i32
    return %c0_i32, %c0_i32_0 : i32, i32
  }
  func.func @transform_3(%arg0: i32) -> (i32, i32) {
    %c0_i32 = arith.constant 0 : i32
    %c0_i32_0 = arith.constant 0 : i32
    %c0_i32_1 = arith.constant 0 : i32
    return %c0_i32, %c0_i32_0 : i32, i32
  }
  func.func @transform_4(%arg0: i32) -> (i32, i32) {
    %c0_i32 = arith.constant 0 : i32
    %c0_i32_0 = arith.constant 0 : i32
    %c0_i32_1 = arith.constant 0 : i32
    return %c0_i32, %c0_i32_0 : i32, i32
  }
  func.func @transform_5(%arg0: i32) -> (i32, i32, i32) {
    %c0_i32 = arith.constant 0 : i32
    %c0_i32_0 = arith.constant 0 : i32
    %c0_i32_1 = arith.constant 0 : i32
    return %arg0, %c0_i32, %c0_i32_0 : i32, i32, i32
  }
}

</mosaic_0001>

<bundles_post_ra>
// kernel: tpu_custom_call.1
= control target key start
LH: loop header
LB: loop body
LE: loop exit
PB: predicated region body
PF: predicated region fallthrough
CT: control target
= control target key end

     0   :  { %10 = vsyncpa [#allocation3], 0  ;;  %s435_s0 = inlined_call_operand.hbm [shape: f32[2,8,128], index: 0, kind: input, shape index: {}]   ;;  %s436_s1 = inlined_call_operand.hbm [shape: f32[2,8,128], index: 1, kind: input, shape index: {}]   ;;  %s437_s2 = inlined_call_operand.hbm [shape: f32[8,128], index: 2, kind: input, shape index: {}]   ;;  %s438_s3 = inlined_call_operand.hbm [shape: f32[1,128], index: 3, kind: input, shape index: {}]   ;;  %s439_s4 = inlined_call_operand.hbm [shape: f32[1,128], index: 4, kind: input, shape index: {}]   ;;  %s440_s5 = inlined_call_operand.hbm [shape: f32[2,8,128], index: 5, kind: output, shape index: {}]  }
   0x1   :  { %11 = vsyncpa [#allocation6], 0 }
   0x2   :  { %12 = vsyncpa [#allocation9], 0 }
   0x3   :  { %13 = vsyncpa [#allocation4], 0  ;;  %s308_s18 = smov [#allocation5]   ;;  %s309_s20 = smov [#allocation8]  }
   0x4   :  { %s31_s19 = sshll.u32 %s308_s18, 4  ;;  %s54_s21 = sshll.u32 %s309_s20, 4  ;;  %s32_s19 = int_to_ptr.vmem [resolvable:$true] %s31_s19  ;;  %s346_s21 = int_to_ptr.vmem [resolvable:$true] %s54_s21 }
   0x5   :  { %s168_s24 = scalar_lea.hbm %s436_s1, 256 }
   0x6   :  { %p169_p0 = scmp.ne.s32.totalorder %s436_s1, %s168_s24  ;;  %p172_p1 = scmp.lt.u32.totalorder %s168_s24, %s436_s1 }
   0x8   :  { %p174_p2 = pnand %p172_p1, %p169_p0 }
   0xa   :  { %177 = shalt.err (!%p174_p2)
}
   0xb   :  { %s178_s29 = scalar_lea.vmem %s32_s19, 256  ;;  %p183_p4 = scmp.lt.s32.totalorder %s32_s19, %s32_s19 }
   0xc   :  { %p179_p3 = scmp.ne.s32.totalorder %s32_s19, %s178_s29  ;;  %p184_p5 = scmp.lt.s32.totalorder %s178_s29, %s178_s29 }
   0xe   :  { %p185_p6 = por %p184_p5, %p183_p4 }
  0x10   :  { %p186_p7 = pnand %p185_p6, %p179_p3 }
  0x12   :  { %189 = shalt.err (!%p186_p7)
}
  0x13   :  { %s310_s30 = smov 128   ;;  %s311_s6 = smov 8  }
  0x14   :  { %37 = dma.hbm_to_vmem [thread:$0]  %s436_s1, 256, %s32_s19, [#allocation6], %s310_s30, %s310_s30, %s311_s6  }
  0x15   :  { %s190_s11 = scalar_lea.hbm %s438_s3, 16 }
  0x16   :  { %p191_p8 = scmp.ne.s32.totalorder %s438_s3, %s190_s11  ;;  %p194_p9 = scmp.lt.u32.totalorder %s190_s11, %s438_s3 }
  0x18   :  { %p196_p10 = pnand %p194_p9, %p191_p8 }
  0x1a   :  { %199 = shalt.err (!%p196_p10)
}
  0x1b   :  { %s200_s16 = scalar_lea.vmem %s346_s21, 16  ;;  %s204_s1 = scalar_lea.vmem %s346_s21, 32 }
  0x1c   :  { %p201_p11 = scmp.ne.s32.totalorder %s346_s21, %s200_s16  ;;  %p205_p12 = scmp.lt.s32.totalorder %s346_s21, %s346_s21 }
  0x1d   :  { %p206_p13 = scmp.lt.s32.totalorder %s204_s1, %s200_s16 }
  0x1f   :  { %p207_p0 = por %p206_p13, %p205_p12 }
  0x21   :  { %p208_p1 = pnand %p207_p0, %p201_p11 }
  0x23   :  { %211 = shalt.err (!%p208_p1)
}
  0x24   :  { %57 = dma.hbm_to_vmem [thread:$0]  %s438_s3, 16, %s346_s21, [#allocation9]  }
  0x25   :  { %s312_s19 = smov [#allocation2]   ;;  %s313_s22 = smov [#allocation7]  }
  0x26   :  { %s19_s20 = sshll.u32 %s312_s19, 4  ;;  %s44_s23 = sshll.u32 %s313_s22, 4  ;;  %s20_s20 = int_to_ptr.vmem [resolvable:$true] %s19_s20  ;;  %s45_s23 = int_to_ptr.vmem [resolvable:$true] %s44_s23 }
  0x27   :  { %s212_s26 = scalar_lea.hbm %s435_s0, 256 }
  0x28   :  { %p213_p2 = scmp.ne.s32.totalorder %s435_s0, %s212_s26  ;;  %p216_p3 = scmp.lt.u32.totalorder %s212_s26, %s435_s0 }
  0x2a   :  { %p218_p4 = pnand %p216_p3, %p213_p2 }
  0x2c   :  { %221 = shalt.err (!%p218_p4)
}
  0x2d   :  { %s222_s3 = scalar_lea.vmem %s20_s20, 256  ;;  %p227_p6 = scmp.lt.s32.totalorder %s20_s20, %s20_s20 }
  0x2e   :  { %p223_p5 = scmp.ne.s32.totalorder %s20_s20, %s222_s3  ;;  %p228_p7 = scmp.lt.s32.totalorder %s222_s3, %s222_s3 }
  0x30   :  { %p229_p8 = por %p228_p7, %p227_p6 }
  0x32   :  { %p230_p9 = pnand %p229_p8, %p223_p5 }
  0x34   :  { %233 = shalt.err (!%p230_p9)
}
  0x35   :  { %25 = dma.hbm_to_vmem [thread:$0]  %s435_s0, 256, %s20_s20, [#allocation3], %s310_s30, %s310_s30, %s311_s6  }
  0x36   :  { %s234_s11 = scalar_lea.hbm %s437_s2, 128 }
  0x37   :  { %p235_p10 = scmp.ne.s32.totalorder %s437_s2, %s234_s11  ;;  %p238_p11 = scmp.lt.u32.totalorder %s234_s11, %s437_s2 }
  0x39   :  { %p240_p12 = pnand %p238_p11, %p235_p10 }
  0x3b   :  { %243 = shalt.err (!%p240_p12)
}
  0x3c   :  { %s244_s16 = scalar_lea.vmem %s45_s23, 128  ;;  %p249_p0 = scmp.lt.s32.totalorder %s45_s23, %s45_s23 }
  0x3d   :  { %p245_p13 = scmp.ne.s32.totalorder %s45_s23, %s244_s16  ;;  %p250_p1 = scmp.lt.s32.totalorder %s244_s16, %s244_s16 }
  0x3f   :  { %p251_p2 = por %p250_p1, %p249_p0 }
  0x41   :  { %p252_p3 = pnand %p251_p2, %p245_p13 }
  0x43   :  { %255 = shalt.err (!%p252_p3)
}
  0x44   :  { %47 = dma.hbm_to_vmem [thread:$0]  %s437_s2, 128, %s45_s23, [#allocation6]  }
  0x45   :  { %s314_s17 = smov [#allocation10]   ;;  %s256_s22 = scalar_lea.hbm %s439_s4, 16 }
  0x46   :  { %s64_s18 = sshll.u32 %s314_s17, 4  ;;  %p257_p4 = scmp.ne.s32.totalorder %s439_s4, %s256_s22  ;;  %s65_s18 = int_to_ptr.vmem [resolvable:$true] %s64_s18 }
  0x47   :  { %p260_p5 = scmp.lt.u32.totalorder %s256_s22, %s439_s4 }
  0x49   :  { %p262_p6 = pnand %p260_p5, %p257_p4 }
  0x4b   :  { %265 = shalt.err (!%p262_p6)
}
  0x4c   :  { %s266_s28 = scalar_lea.vmem %s65_s18, 16  ;;  %s270_s2 = scalar_lea.vmem %s65_s18, 32 }
  0x4d   :  { %p267_p7 = scmp.ne.s32.totalorder %s65_s18, %s266_s28  ;;  %p271_p8 = scmp.lt.s32.totalorder %s65_s18, %s65_s18 }
  0x4e   :  { %p272_p9 = scmp.lt.s32.totalorder %s270_s2, %s266_s28 }
  0x50   :  { %p273_p10 = por %p272_p9, %p271_p8 }
  0x52   :  { %p274_p11 = pnand %p273_p10, %p267_p7 }
  0x54   :  { %277 = shalt.err (!%p274_p11)
}
  0x55   :  { %67 = dma.hbm_to_vmem [thread:$0]  %s439_s4, 16, %s65_s18, [#allocation9]  }
  0x56   :  { %300 = dma.done.wait [#allocation3], 256  }
  0x57   :  { %301 = vsyncadd [#allocation3], 4294967040 }
  0x58   :  { %302 = dma.done.wait [#allocation6], 384  }
  0x59   :  { %303 = vsyncadd [#allocation6], 4294966912 }
  0x5a   :  { %304 = dma.done.wait [#allocation9], 32  }
  0x5b   :  { %305 = vsyncadd [#allocation9], 4294967264  ;;  %v83_v0 = vld [vmem:[#allocation2] sm:$0xff]  ;;  %v85_v1 = vld [vmem:[#allocation5] sm:$0xff]  ;;  %s315_s4 = smov [#allocation11]  }
  0x5c   :  { %v89_v2 = vld [vmem:[#allocation7] sm:$0xff]  ;;  %v87_v3 = vadd.f32 %v85_v1, %v83_v0  ;;  %v84_v4 = vld [vmem:[#allocation2 + $0x8] sm:$0xff]  ;;  %v86_v5 = vld [vmem:[#allocation5 + $0x8] sm:$0xff]  ;;  %s140_s7 = sshll.u32 %s315_s4, 4  ;;  %s141_s7 = int_to_ptr.vmem [resolvable:$true] %s140_s7 }
  0x5d   :  { %v88_v6 = vadd.f32 %v86_v5, %v84_v4  ;;  %v154_v24 = vld [vmem:[#allocation8] ss:$0 sm:$0xff]  ;;  %v155_v26 = vld [vmem:[#allocation10] ss:$0 sm:$0xff]  ;;  %s278_s3 = scalar_lea.vmem %s141_s7, 256  ;;  %p283_p13 = scmp.lt.s32.totalorder %s141_s7, %s141_s7 }
  0x5e   :  { %v90_v7 = vadd.f32 %v89_v2, %v87_v3  ;;  %p279_p12 = scmp.ne.s32.totalorder %s141_s7, %s278_s3  ;;  %p284_p0 = scmp.lt.s32.totalorder %s278_s3, %s278_s3 }
  0x5f   :  { %v91_v8 = vadd.f32 %v89_v2, %v88_v6 }
  0x60   :  { %94 = vadd.xlane.f32.xlu0 %v90_v7  ;;  %p285_p1 = por %p284_p0, %p283_p13 }
  0x62   :  { %p286_p2 = pnand %p285_p1, %p279_p12 }
  0x64   :  { %96 = vadd.xlane.f32.xlu0 %v91_v8 }
  0xed   :  { %v95_v9 = vpop.xlane.xlu0 %94 }
  0xee   :  { %v99_v10 = vmul.f32 0.0078125, %v95_v9 }
  0xf0   :  { %v101_v11 = vsub.f32 %v90_v7, %v99_v10 }
  0xf1   :  { %v97_v12 = vpop.xlane.xlu0 %96 }
  0xf2   :  { %v100_v13 = vmul.f32 0.0078125, %v97_v12  ;;  %v103_v14 = vmul.f32 %v101_v11, %v101_v11 }
  0xf4   :  { %v102_v15 = vsub.f32 %v91_v8, %v100_v13  ;;  %105 = vadd.xlane.f32.xlu1 %v103_v14 }
  0xf6   :  { %v104_v16 = vmul.f32 %v102_v15, %v102_v15 }
  0xf8   :  { %107 = vadd.xlane.f32.xlu1 %v104_v16 }
 0x181   :  { %v106_v17 = vpop.xlane.xlu1 %105 }
 0x182   :  { %v109_v18 = vmul.f32 0.0078125, %v106_v17 }
 0x184   :  { %v111_v19 = vadd.f32 1e-12, %v109_v18 }
 0x185   :  { %v108_v20 = vpop.xlane.xlu1 %107 }
 0x186   :  { %164 = vrsqrt.f32 %v111_v19  ;;  %v110_v21 = vmul.f32 0.0078125, %v108_v20 }
 0x188   :  { %v112_v22 = vadd.f32 1e-12, %v110_v21 }
 0x18a   :  { %166 = vrsqrt.f32 %v112_v22 }
 0x190   :  { %v165_v23 = vpop.eup %164 }
 0x191   :  { %v115_v25 = vmul.f32 %v165_v23, %v101_v11 }
 0x193   :  { %v123_v27 = vmul.f32 %v154_v24, %v115_v25 }
 0x194   :  { %v167_v28 = vpop.eup %166 }
 0x195   :  { %v116_v29 = vmul.f32 %v167_v28, %v102_v15  ;;  %v131_v30 = vadd.f32 %v155_v26, %v123_v27 }
 0x197   :  { %v124_v31 = vmul.f32 %v154_v24, %v116_v29  ;;  %133 = vst [vmem:[#allocation11] sm:$0xff] %v131_v30 }
 0x199   :  { %v132_v32 = vadd.f32 %v155_v26, %v124_v31 }
 0x19b   :  { %134 = vst [vmem:[#allocation11 + $0x8] sm:$0xff] %v132_v32 }
 0x19c   :  { %289 = shalt.err (!%p286_p2)
}
 0x19d   :  { %s290_s9 = scalar_lea.hbm %s440_s5, 256 }
 0x19e   :  { %p291_p3 = scmp.ne.s32.totalorder %s440_s5, %s290_s9  ;;  %p294_p4 = scmp.lt.u32.totalorder %s290_s9, %s440_s5 }
 0x1a0   :  { %p296_p5 = pnand %p294_p4, %p291_p3 }
 0x1a2   :  { %299 = shalt.err (!%p296_p5)
}
 0x1a3   :  { %146 = dma.vmem_to_hbm [thread:$0]  %s141_s7, 256, %s440_s5, [#allocation4], %s310_s30, %s310_s30, %s311_s6  }
 0x1a4   :  { %306 = dma.done.wait [#allocation4], 256  }
 0x1a5   :  { %307 = vsyncadd [#allocation4], 4294967040 }
 0x1a6   :  { %150 = vsyncpa [#allocation3], 1 }
 0x1a7   :  { %151 = vsyncpa [#allocation6], 1 }
 0x1a8   :  { %152 = vsyncpa [#allocation9], 1 }
 0x1a9   :  { %153 = vsyncpa [#allocation4], 1 }

</bundles_post_ra>
